<compile_context>
chip_gen: v6e
topology: v6e:2x2x1
jax: 0.10.0
libtpu: 0.0.40
codegen_flags: <defaults>
</compile_context>

<pallas_src>
import math

import jax
import jax.numpy as jnp
from jax.experimental import pallas as pl
from jax.experimental.pallas import tpu as pltpu

LANE = 128                            # TPU lane width
TARGET_TILE_BYTES = 4 * 1024 * 1024   # ~4 MiB per buffer (v7x-safe, ~roofline)


def _scale_kernel(x_ref, s_ref, o_ref):
    """out = x * scale, scale broadcasting over the feature dims."""
    o_ref[...] = x_ref[...] * s_ref[...]


def _per_sample_scale(key, batch, keep_prob, dtype):
    """floor(keep_prob + U[0,1)) / keep_prob -> 0 or 1/keep_prob per sample."""
    u = jax.random.uniform(key, (batch,), dtype=jnp.float32)
    keep = jnp.floor(keep_prob + u)
    return (keep / keep_prob).astype(dtype)


def drop_path(x, drop_prob: float = 0.0, training: bool = False, *,
              key=None, seed: int = 0):
    """Pallas equivalent of torch `drop_path(x, drop_prob, training)`.

    Pass a fresh `key` (or `seed`) each call to mirror torch's per-forward
    randomness (a fixed default seed would drop the same samples every step).
    """
    if drop_prob == 0.0 or not training:
        return x                                     # exact identity fast path
    keep_prob = 1.0 - drop_prob
    if key is None:
        key = jax.random.PRNGKey(seed)

    B = x.shape[0]
    F = math.prod(x.shape[1:])                       # flattened feature count
    itemsize = jnp.dtype(x.dtype).itemsize
    scale = _per_sample_scale(key, B, keep_prob, x.dtype)        # (B,)

    if F % LANE == 0:
        # ----- dense-sublane path: view x as (B, R, 128), no padding -----
        R = F // LANE
        x3 = x.reshape(B, R, LANE)
        s3 = scale.reshape(B, 1, 1)

        rows_budget = max(8, (TARGET_TILE_BYTES // (LANE * itemsize)) // 8 * 8)
        tile_r = R if R <= rows_budget else rows_budget          # mult-of-8 or full
        tile_b = max(1, min(B, TARGET_TILE_BYTES // (tile_r * LANE * itemsize)))
        tile_bytes = tile_b * tile_r * LANE * itemsize

        grid = (pl.cdiv(B, tile_b), pl.cdiv(R, tile_r))
        in_specs = [pl.BlockSpec((tile_b, tile_r, LANE), lambda b, r: (b, r, 0)),
                    pl.BlockSpec((tile_b, 1, 1), lambda b, r: (b, 0, 0))]
        out_specs = pl.BlockSpec((tile_b, tile_r, LANE), lambda b, r: (b, r, 0))
        out_shape = jax.ShapeDtypeStruct(x3.shape, x3.dtype)
        dims = ("parallel", "parallel")
        operands = (x3, s3)
    else:
        # ----- fallback: (B, F) view, feature-axis tiling, resident scale -----
        # TODO(synk): small B leaves sublanes sparse here; only hit when the
        # flattened feature count is not a multiple of 128.
        x2 = x.reshape(B, F)
        s2 = scale[:, None]                                      # (B, 1)

        f_budget = max(LANE, (TARGET_TILE_BYTES // (B * itemsize)) // LANE * LANE)
        tile_f = F if F <= f_budget else f_budget                # mult-of-128 or full
        tile_bytes = B * tile_f * itemsize

        grid = (pl.cdiv(F, tile_f),)
        in_specs = [pl.BlockSpec((B, tile_f), lambda j: (0, j)),
                    pl.BlockSpec((B, 1), lambda j: (0, 0))]      # resident scale
        out_specs = pl.BlockSpec((B, tile_f), lambda j: (0, j))
        out_shape = jax.ShapeDtypeStruct((B, F), x2.dtype)
        dims = ("parallel",)
        operands = (x2, s2)

    # double-buffered in + out tiles plus slack; well under every gen's VMEM
    vmem_bytes = int(min(48 * 1024 * 1024, max(16 * 1024 * 1024, 5 * tile_bytes)))

    out = pl.pallas_call(
        _scale_kernel,
        out_shape=out_shape,
        grid=grid,
        in_specs=in_specs,
        out_specs=out_specs,
        compiler_params=pltpu.CompilerParams(
            dimension_semantics=dims,
            vmem_limit_bytes=vmem_bytes,
        ),
    )(*operands)

    return out.reshape(x.shape)


if __name__ == "__main__":
    # DropPath acts per-sample on the residual branch; exercise a small 4-D
    # activation (dense path) and an odd-shaped one (fallback path).
    B, C, H, W = 2, 4, 16, 16
    drop_prob = 0.25
    keep_prob = 1.0 - drop_prob

    key = jax.random.PRNGKey(0)
    kx, kd = jax.random.split(key)
    x = jax.random.normal(kx, (B, C, H, W), jnp.float32)

    # eval mode / drop_prob == 0 -> exact identity (matches torch fast path)
    y_eval = drop_path(x, drop_prob=drop_prob, training=False)
    assert y_eval is x

    # training mode: per-sample stochastic depth via the Pallas kernel
    y = drop_path(x, drop_prob=drop_prob, training=True, key=kd)
    y = jax.block_until_ready(y)
    assert y.shape == x.shape and y.dtype == x.dtype
    assert bool(jnp.all(jnp.isfinite(y)))

    # every sample must be either fully dropped (zeros) or scaled by 1/keep_prob
    xf = x.reshape(B, -1)
    yf = y.reshape(B, -1)
    for b in range(B):
        dropped = bool(jnp.all(yf[b] == 0.0))
        kept = bool(jnp.allclose(yf[b], xf[b] / keep_prob, rtol=1e-6, atol=1e-6))
        assert dropped or kept, f"sample {b}: not a valid drop-path output"

    # non-lane-divisible feature count exercises the (B, F) fallback path
    x_odd = jax.random.normal(kx, (3, 5, 7), jnp.float32)       # F = 35
    y_odd = jax.block_until_ready(
        drop_path(x_odd, drop_prob=0.5, training=True, key=kd))
    xo = x_odd.reshape(3, -1)
    yo = y_odd.reshape(3, -1)
    for b in range(3):
        dropped = bool(jnp.all(yo[b] == 0.0))
        kept = bool(jnp.allclose(yo[b], xo[b] / 0.5, rtol=1e-6, atol=1e-6))
        assert dropped or kept, f"odd sample {b}: not a valid drop-path output"

    print("KERNEL_OK")
</pallas_src>

<mosaic_0001>
module attributes {stable_mosaic.version = 11 : i64} {
  func.func @_scale_kernel(%arg0: i32, %arg1: i32, %arg2: memref<2x8x128xf32, #tpu.memory_space<vmem>>, %arg3: memref<2x1x1xf32, #tpu.memory_space<vmem>>, %arg4: memref<2x8x128xf32, #tpu.memory_space<vmem>>) attributes {dimension_semantics = [#tpu.dimension_semantics<parallel>, #tpu.dimension_semantics<parallel>], iteration_bounds = array<i64: 1, 1>, scalar_prefetch = 0 : i64, scratch_operands = 0 : i64, tpu.core_type = #tpu.core_type<tc>, window_params = [{transform_indices = @transform_0, window_bounds = array<i64: 2, 8, 128>}, {transform_indices = @transform_1, window_bounds = array<i64: 2, 1, 1>}, {transform_indices = @transform_2, window_bounds = array<i64: 2, 8, 128>}]} {
    %c0 = arith.constant 0 : index
    %c0_0 = arith.constant 0 : index
    %c0_1 = arith.constant 0 : index
    %0 = vector.load %arg2[%c0, %c0_0, %c0_1] : memref<2x8x128xf32, #tpu.memory_space<vmem>>, vector<2x8x128xf32>
    %c0_2 = arith.constant 0 : index
    %c0_3 = arith.constant 0 : index
    %c0_4 = arith.constant 0 : index
    %1 = vector.load %arg3[%c0_2, %c0_3, %c0_4] : memref<2x1x1xf32, #tpu.memory_space<vmem>>, vector<2x1x1xf32>
    %2 = vector.broadcast %1 : vector<2x1x1xf32> to vector<2x8x128xf32>
    %3 = arith.mulf %0, %2 : vector<2x8x128xf32>
    %c0_5 = arith.constant 0 : index
    %c0_6 = arith.constant 0 : index
    %c0_7 = arith.constant 0 : index
    %4 = vector.load %arg4[%c0_5, %c0_6, %c0_7] : memref<2x8x128xf32, #tpu.memory_space<vmem>>, vector<2x8x128xf32>
    tpu.vector_store %arg4[%c0_5, %c0_6, %c0_7], %3 {strides = array<i32>} : memref<2x8x128xf32, #tpu.memory_space<vmem>>, vector<2x8x128xf32>,
    return
  }
  func.func @transform_0(%arg0: i32, %arg1: i32) -> (i32, i32, i32) {
    %c0_i32 = arith.constant 0 : i32
    %c0_i32_0 = arith.constant 0 : i32
    return %arg0, %arg1, %c0_i32 : i32, i32, i32
  }
  func.func @transform_1(%arg0: i32, %arg1: i32) -> (i32, i32, i32) {
    %c0_i32 = arith.constant 0 : i32
    %c0_i32_0 = arith.constant 0 : i32
    %c0_i32_1 = arith.constant 0 : i32
    return %arg0, %c0_i32, %c0_i32_0 : i32, i32, i32
  }
  func.func @transform_2(%arg0: i32, %arg1: i32) -> (i32, i32, i32) {
    %c0_i32 = arith.constant 0 : i32
    %c0_i32_0 = arith.constant 0 : i32
    return %arg0, %arg1, %c0_i32 : i32, i32, i32
  }
}

</mosaic_0001>

<bundles_post_ra>
// kernel: tpu_custom_call.1
= control target key start
LH: loop header
LB: loop body
LE: loop exit
PB: predicated region body
PF: predicated region fallthrough
CT: control target
= control target key end

     0   :  { %7 = vsyncpa [#allocation3], 0  ;;  %s159_s0 = inlined_call_operand.hbm [shape: f32[2,8,128], index: 0, kind: input, shape index: {}]   ;;  %s160_s1 = inlined_call_operand.vmem [shape: f32[2,1,1], index: 1, kind: input, shape index: {}]   ;;  %s161_s2 = inlined_call_operand.hbm [shape: f32[2,8,128], index: 2, kind: output, shape index: {}]  }
   0x1   :  { %8 = vsyncpa [#allocation4], 0  ;;  %s121_s9 = smov [#allocation2]  }
   0x2   :  { %s14_s10 = sshll.u32 %s121_s9, 4  ;;  %s15_s10 = int_to_ptr.vmem [resolvable:$true] %s14_s10 }
   0x3   :  { %s85_s11 = scalar_lea.vmem %s15_s10, 256  ;;  %p90_p1 = scmp.lt.s32.totalorder %s15_s10, %s15_s10 }
   0x4   :  { %p86_p0 = scmp.ne.s32.totalorder %s15_s10, %s85_s11  ;;  %p91_p2 = scmp.lt.s32.totalorder %s85_s11, %s85_s11 }
   0x6   :  { %p92_p3 = por %p91_p2, %p90_p1 }
   0x8   :  { %p93_p4 = pnand %p92_p3, %p86_p0 }
   0xa   :  { %96 = shalt.err (!%p93_p4)
}
   0xb   :  { %s122_s12 = smov 128   ;;  %s123_s13 = smov 8  }
   0xc   :  { %20 = dma.hbm_to_vmem [thread:$0]  %s159_s0, 256, %s15_s10, [#allocation3], %s122_s12, %s122_s12, %s123_s13  }
   0xd   :  { %117 = dma.done.wait [#allocation3], 256  }
   0xe   :  { %118 = vsyncadd [#allocation3], 4294967040  ;;  %v124_v0 = vmov 0   ;;  %v69_v1 = vld [vmem:[%s160_s1] ss:$0 sm:$0xff]  ;;  %v27_v6 = vld [vmem:[#allocation2 + $0x8] sm:$0xff] }
   0xf   :  { %76 = vset.pattern.permute.xlu0 %v124_v0  ;;  %v70_v2 = vld [vmem:[%s160_s1 + $0x1] ss:$0 sm:$0xff]  ;;  %s125_s20 = smov [#allocation5]  }
  0x10   :  { %41 = vperm.xlu0 %76, %v69_v1   ;;  %v26_v3 = vld [vmem:[#allocation2] sm:$0xff]  ;;  %s57_s0 = sshll.u32 %s125_s20, 4  ;;  %s58_s0 = int_to_ptr.vmem [resolvable:$true] %s57_s0 }
  0x11   :  { %s97_s21 = scalar_lea.vmem %s58_s0, 256  ;;  %p102_p6 = scmp.lt.s32.totalorder %s58_s0, %s58_s0 }
  0x12   :  { %p98_p5 = scmp.ne.s32.totalorder %s58_s0, %s97_s21  ;;  %p103_p7 = scmp.lt.s32.totalorder %s97_s21, %s97_s21 }
  0x14   :  { %45 = vperm.xlu0 %76, %v70_v2   ;;  %p104_p8 = por %p103_p7, %p102_p6 }
  0x16   :  { %p105_p9 = pnand %p104_p8, %p98_p5 }
  0x8b   :  { %v42_v4 = vpop.permute.xlu0 %41 }
  0x8c   :  { %v48_v5 = vmul.f32 %v42_v4, %v26_v3 }
  0x8e   :  { %50 = vst [vmem:[#allocation5] sm:$0xff] %v48_v5 }
  0x8f   :  { %v46_v7 = vpop.permute.xlu0 %45 }
  0x90   :  { %v49_v8 = vmul.f32 %v46_v7, %v27_v6 }
  0x92   :  { %51 = vst [vmem:[#allocation5 + $0x8] sm:$0xff] %v49_v8 }
  0x93   :  { %108 = shalt.err (!%p105_p9)
}
  0x94   :  { %63 = dma.vmem_to_hbm [thread:$0]  %s58_s0, 256, %s161_s2, [#allocation4], %s122_s12, %s122_s12, %s123_s13  }
  0x95   :  { %119 = dma.done.wait [#allocation4], 256  }
  0x96   :  { %120 = vsyncadd [#allocation4], 4294967040 }
  0x97   :  { %67 = vsyncpa [#allocation3], 1 }
  0x98   :  { %68 = vsyncpa [#allocation4], 1 }

</bundles_post_ra>
